<compile_context>
chip_gen: v6e
topology: v6e:2x2x1
jax: 0.10.0
libtpu: 0.0.40
codegen_flags: <defaults>
</compile_context>

<pallas_src>
import functools
import re

import jax
import jax.numpy as jnp
from jax.experimental import pallas as pl
from jax.experimental.pallas import tpu as pltpu


def _round_up(x, k):
    return ((x + k - 1) // k) * k


def _tpu_generation():
    """Best-effort TPU generation (5, 6, 7, ...) from device_kind; 0 if unknown."""
    try:
        kind = jax.devices()[0].device_kind
    except Exception:
        return 0
    m = re.search(r"(\d+)", str(kind))
    return int(m.group(1)) if m else 0


def _sublane_multiple(dtype):
    """Sublane packing for the dtype: 8 for f32, 16 for bf16/f16, 32 for int8."""
    return max(8, 32 // jnp.dtype(dtype).itemsize)


def _choose_tile_n(n, m, itemsize, sublane, vmem_budget_bytes):
    """Largest row tile whose pipelined working set fits the VMEM budget."""
    lane_m = _round_up(max(m, 1), 128)
    sim_row = lane_m * itemsize           # one VMEM row of the similarity block
    idx_row = 128 * 4                     # (tile_n,1) int32 block pads lanes to 128
    temp_rows = 4 * lane_m * 4            # allowance for block-sized f32 temporaries
    per_row = 2 * (sim_row + idx_row) + temp_rows   # x2: double-buffered inputs
    fixed = 8 * lane_m * 4 + (1 << 20)    # f32 accumulator scratch + slack
    rows = max(vmem_budget_bytes - fixed, per_row) // per_row
    tile = max(sublane, (rows // sublane) * sublane)
    tile = min(tile, 8192)                              # cap lifted from 2048
    tile = min(tile, _round_up(max(n, 1), sublane))     # never exceed padded batch
    return tile


def _margin_loss_kernel(sim_ref, idx_ref, out_ref, acc_ref, *,
                        margin, n_total, tile_n, tiles_per_core,
                        compute_dtype, may_mask):
    c = pl.program_id(0)   # core shard (parallel axis; size 2 on v7x, else 1)
    i = pl.program_id(1)   # row tile within the shard (arbitrary axis)
    tn, m = sim_ref.shape

    # Zero the per-lane accumulator at the start of each core shard.
    @pl.when(i == 0)
    def _():
        acc_ref[...] = jnp.zeros_like(acc_ref)

    # Native-dtype HBM traffic; hinge math in compute_dtype (bf16 on v6e/v7x
    # for bf16 inputs, else f32).
    sim = sim_ref[...].astype(compute_dtype)            # (tn, m)
    idx = idx_ref[...]                                  # (tn, 1) int32

    zero = jnp.asarray(0, compute_dtype)
    col_ids = jax.lax.broadcasted_iota(jnp.int32, (tn, m), 1)
    # pos_sim[b] = sim[b, true[b]] via one-hot select; lane-reduce in f32,
    # then the tiny (tn,1) result is cast back for the hinge math.
    selected = jnp.where(col_ids == idx, sim, zero)
    pos_sim = jnp.sum(selected, axis=1, keepdims=True,
                      dtype=jnp.float32).astype(compute_dtype)

    margin_c = jnp.asarray(margin, compute_dtype)
    hinge = jnp.maximum(sim + margin_c - pos_sim, zero)
    # f32 for the cross-row accumulation (exact even when hinge is bf16-rounded).
    hinge_f32 = hinge.astype(jnp.float32)

    global_tile = c * tiles_per_core + i

    if may_mask:
        tile_end = (global_tile + 1) * tile_n

        @pl.when(tile_end <= n_total)      # full tile: no mask work at all
        def _():
            acc_ref[...] += jnp.sum(hinge_f32, axis=0, keepdims=True)

        @pl.when(tile_end > n_total)       # overrunning tile: mask padded rows
        def _():
            row_ids = (jax.lax.broadcasted_iota(jnp.int32, (tn, 1), 0)
                       + global_tile * tile_n)
            # Mask AFTER relu so garbage (possibly NaN) out-of-range rows zero out.
            masked = jnp.where(row_ids < n_total, hinge_f32, 0.0)
            acc_ref[...] += jnp.sum(masked, axis=0, keepdims=True)
    else:
        acc_ref[...] += jnp.sum(hinge_f32, axis=0, keepdims=True)

    @pl.when(i == tiles_per_core - 1)
    def _():
        # Raw per-core partial sum; mean scale + exact_loss_value correction
        # are applied in the wrapper after summing the per-core partials.
        out_ref[0, 0] = jnp.sum(acc_ref[...])


def margin_loss(similarities, true_indices, *, margin=1.0,
                exact_loss_value=False, tile_n=None):
    """Pallas equivalent of MarginLoss.forward (ReLU / hard-margin activation)."""
    n, m = similarities.shape
    idx2d = true_indices.astype(jnp.int32).reshape(n, 1)
    dtype = similarities.dtype
    itemsize = jnp.dtype(dtype).itemsize

    gen = _tpu_generation()
    sublane = _sublane_multiple(dtype)

    # Generation-aware scoped-VMEM target (v7x has only 64 MiB physical VMEM).
    if gen >= 7:
        vmem_limit = 40 * 1024 * 1024
    elif gen >= 4:
        vmem_limit = 64 * 1024 * 1024
    else:
        vmem_limit = 32 * 1024 * 1024

    if tile_n is None:
        tile_n = _choose_tile_n(n, m, itemsize, sublane,
                                vmem_limit - 4 * 1024 * 1024)
    else:
        tile_n = max(sublane, _round_up(int(tile_n), sublane))

    total_tiles = pl.cdiv(n, tile_n)
    # v7x: split the row space across the 2 TensorCores via a parallel axis.
    num_cores = 2 if (gen >= 7 and total_tiles >= 2) else 1
    tiles_per_core = pl.cdiv(total_tiles, num_cores)
    padded_rows = num_cores * tiles_per_core * tile_n
    may_mask = padded_rows != n
    last_tile = total_tiles - 1

    # bf16 hinge math only on generations with bf16 VALUs (v6e/v7x); v5e keeps f32.
    use_bf16_math = (dtype == jnp.bfloat16) and gen >= 6
    compute_dtype = jnp.bfloat16 if use_bf16_math else jnp.float32

    kernel = functools.partial(
        _margin_loss_kernel,
        margin=float(margin),
        n_total=n,
        tile_n=tile_n,
        tiles_per_core=tiles_per_core,
        compute_dtype=compute_dtype,
        may_mask=may_mask,
    )

    def row_map(c, i):
        # Clamp so a padded (duplicate) tile on the last core stays in bounds;
        # its rows are fully masked inside the kernel.
        return (jnp.minimum(c * tiles_per_core + i, last_tile), 0)

    partials = pl.pallas_call(
        kernel,
        out_shape=jax.ShapeDtypeStruct((num_cores, 1), jnp.float32),
        grid=(num_cores, tiles_per_core),
        in_specs=[
            pl.BlockSpec((tile_n, m), row_map),
            pl.BlockSpec((tile_n, 1), row_map),
        ],
        out_specs=pl.BlockSpec((1, 1), lambda c, i: (c, 0),
                               memory_space=pltpu.SMEM),
        scratch_shapes=[pltpu.VMEM((1, m), jnp.float32)],
        compiler_params=pltpu.CompilerParams(
            dimension_semantics=("parallel", "arbitrary"),
            vmem_limit_bytes=vmem_limit,
        ),
        cost_estimate=pl.CostEstimate(
            flops=6 * n * m,
            transcendentals=0,
            bytes_accessed=n * m * itemsize + n * 4 + num_cores * 4,
        ),
    )(similarities, idx2d)

    loss = jnp.sum(partials) / (n * m)
    if exact_loss_value:
        loss = loss - max(float(margin), 0.0) / m
    return loss


def _reference_margin_loss(similarities, true_indices, margin=1.0,
                           exact_loss_value=False):
    sim = similarities.astype(jnp.float32)
    n, m = sim.shape
    pos = sim[jnp.arange(n), true_indices][:, None]
    loss = jnp.mean(jax.nn.relu(sim + margin - pos))
    if exact_loss_value:
        loss = loss - jax.nn.relu(jnp.float32(margin)) / m
    return loss


if __name__ == "__main__":
    key = jax.random.PRNGKey(0)
    k1, k2, k3, k4, k5, k6 = jax.random.split(key, 6)

    # Case 1: f32, batch not a multiple of 8, choices not a multiple of 128
    # (exercises the masked partial tile), exact_loss_value both ways.
    n1, m1 = 10, 160
    sim1 = jax.random.normal(k1, (n1, m1), dtype=jnp.float32)
    idx1 = jax.random.randint(k2, (n1,), 0, m1, dtype=jnp.int32)

    out1 = jax.block_until_ready(margin_loss(sim1, idx1, margin=1.0))
    ref1 = _reference_margin_loss(sim1, idx1, margin=1.0)
    assert jnp.allclose(out1, ref1, atol=1e-5, rtol=1e-5), (out1, ref1)

    out1e = jax.block_until_ready(
        margin_loss(sim1, idx1, margin=1.0, exact_loss_value=True))
    ref1e = _reference_margin_loss(sim1, idx1, margin=1.0,
                                   exact_loss_value=True)
    assert jnp.allclose(out1e, ref1e, atol=1e-5, rtol=1e-5), (out1e, ref1e)

    # Case 2: bf16 input, multi-tile grid with a partial last tile
    # (tile_n=16 over n=50). Exercises the bf16 hinge path on v6e/v7x and the
    # 2-TensorCore row split on v7x. Tolerance widened for bf16-rounded hinge.
    n2, m2 = 50, 160
    sim2 = jax.random.normal(k3, (n2, m2), dtype=jnp.float32).astype(jnp.bfloat16)
    idx2 = jax.random.randint(k4, (n2,), 0, m2, dtype=jnp.int32)

    out2 = jax.block_until_ready(
        margin_loss(sim2, idx2, margin=0.5, tile_n=16))
    ref2 = _reference_margin_loss(sim2, idx2, margin=0.5)
    assert jnp.allclose(out2, ref2, atol=5e-3, rtol=5e-3), (out2, ref2)

    # Case 3: f32 with an odd number of row tiles (3) — on v7x this exercises
    # the clamped duplicate tile on the second core plus the gated mask branch.
    n3, m3 = 40, 200
    sim3 = jax.random.normal(k5, (n3, m3), dtype=jnp.float32)
    idx3 = jax.random.randint(k6, (n3,), 0, m3, dtype=jnp.int32)

    out3 = jax.block_until_ready(
        margin_loss(sim3, idx3, margin=1.0, tile_n=16))
    ref3 = _reference_margin_loss(sim3, idx3, margin=1.0)
    assert jnp.allclose(out3, ref3, atol=1e-5, rtol=1e-5), (out3, ref3)

    print("KERNEL_OK")
</pallas_src>

<mosaic_0001>
module attributes {stable_mosaic.version = 11 : i64} {
  func.func @_margin_loss_kernel(%arg0: i32, %arg1: i32, %arg2: memref<16x160xf32, #tpu.memory_space<vmem>>, %arg3: memref<16x1xi32, #tpu.memory_space<vmem>>, %arg4: memref<1x1xf32, #tpu.memory_space<smem>>, %arg5: memref<1x160xf32, #tpu.memory_space<vmem>>) attributes {dimension_semantics = [#tpu.dimension_semantics<parallel>, #tpu.dimension_semantics<arbitrary>], iteration_bounds = array<i64: 1, 1>, scalar_prefetch = 0 : i64, scratch_operands = 1 : i64, tpu.core_type = #tpu.core_type<tc>, window_params = [{transform_indices = @transform_0, window_bounds = array<i64: 16, 160>}, {transform_indices = @transform_1, window_bounds = array<i64: 16, 1>}, {transform_indices = @transform_2, window_bounds = array<i64: 1, 1>}]} {
    %c0_i32 = arith.constant 0 : i32
    %0 = arith.cmpi eq, %arg1, %c0_i32 : i32
    %1 = arith.extui %0 : i1 to i32
    %c0_i32_0 = arith.constant 0 : i32
    %2 = arith.cmpi ne, %1, %c0_i32_0 : i32
    scf.if %2 {
      %cst_13 = arith.constant 0.000000e+00 : f32
      %31 = vector.broadcast %cst_13 : f32 to vector<1x160xf32>
      %c0_14 = arith.constant 0 : index
      %c0_15 = arith.constant 0 : index
      %32 = vector.load %arg5[%c0_14, %c0_15] : memref<1x160xf32, #tpu.memory_space<vmem>>, vector<1x160xf32>
      tpu.vector_store %arg5[%c0_14, %c0_15], %31 {strides = array<i32>} : memref<1x160xf32, #tpu.memory_space<vmem>>, vector<1x160xf32>,
    } else {
    }
    %c0 = arith.constant 0 : index
    %c0_1 = arith.constant 0 : index
    %3 = vector.load %arg2[%c0, %c0_1] : memref<16x160xf32, #tpu.memory_space<vmem>>, vector<16x160xf32>
    %c0_2 = arith.constant 0 : index
    %c0_3 = arith.constant 0 : index
    %4 = vector.load %arg3[%c0_2, %c0_3] : memref<16x1xi32, #tpu.memory_space<vmem>>, vector<16x1xi32>
    %5 = tpu.iota {dimensions = array<i32: 1>} : vector<16x160xi32>
    %6 = vector.broadcast %4 : vector<16x1xi32> to vector<16x160xi32>
    %7 = arith.cmpi eq, %5, %6 : vector<16x160xi32>
    %cst = arith.constant 0.000000e+00 : f32
    %8 = vector.broadcast %cst : f32 to vector<16x160xf32>
    %9 = arith.select %7, %3, %8 : vector<16x160xi1>, vector<16x160xf32>
    %cst_4 = arith.constant dense<0.000000e+00> : vector<16xf32>
    %10 = vector.multi_reduction <add>, %9, %cst_4 [1] : vector<16x160xf32> to vector<16xf32>
    %11 = vector.shape_cast %10 : vector<16xf32> to vector<16x1xf32>
    %cst_5 = arith.constant 1.000000e+00 : f32
    %12 = vector.broadcast %cst_5 : f32 to vector<16x160xf32>
    %13 = arith.addf %3, %12 : vector<16x160xf32>
    %14 = vector.broadcast %11 : vector<16x1xf32> to vector<16x160xf32>
    %15 = arith.subf %13, %14 : vector<16x160xf32>
    %cst_6 = arith.constant 0.000000e+00 : f32
    %16 = vector.broadcast %cst_6 : f32 to vector<16x160xf32>
    %17 = arith.maximumf %15, %16 : vector<16x160xf32>
    %c1_i32 = arith.constant 1 : i32
    %18 = arith.muli %arg0, %c1_i32 : i32
    %19 = arith.addi %18, %arg1 : i32
    %c1_i32_7 = arith.constant 1 : i32
    %20 = arith.addi %19, %c1_i32_7 : i32
    %c16_i32 = arith.constant 16 : i32
    %21 = arith.muli %20, %c16_i32 : i32
    %c10_i32 = arith.constant 10 : i32
    %22 = arith.cmpi sle, %21, %c10_i32 : i32
    %23 = arith.extui %22 : i1 to i32
    %c0_i32_8 = arith.constant 0 : i32
    %24 = arith.cmpi ne, %23, %c0_i32_8 : i32
    scf.if %24 {
      %c0_13 = arith.constant 0 : index
      %c0_14 = arith.constant 0 : index
      %31 = vector.load %arg5[%c0_13, %c0_14] : memref<1x160xf32, #tpu.memory_space<vmem>>, vector<1x160xf32>
      %cst_15 = arith.constant dense<0.000000e+00> : vector<160xf32>
      %32 = vector.multi_reduction <add>, %17, %cst_15 [0] : vector<16x160xf32> to vector<160xf32>
      %33 = vector.shape_cast %32 : vector<160xf32> to vector<1x160xf32>
      %34 = arith.addf %31, %33 : vector<1x160xf32>
      %c0_16 = arith.constant 0 : index
      %c0_17 = arith.constant 0 : index
      %35 = vector.load %arg5[%c0_16, %c0_17] : memref<1x160xf32, #tpu.memory_space<vmem>>, vector<1x160xf32>
      tpu.vector_store %arg5[%c0_16, %c0_17], %34 {strides = array<i32>} : memref<1x160xf32, #tpu.memory_space<vmem>>, vector<1x160xf32>,
    } else {
    }
    %c10_i32_9 = arith.constant 10 : i32
    %25 = arith.cmpi sgt, %21, %c10_i32_9 : i32
    %26 = arith.extui %25 : i1 to i32
    %c0_i32_10 = arith.constant 0 : i32
    %27 = arith.cmpi ne, %26, %c0_i32_10 : i32
    scf.if %27 {
      %31 = tpu.iota {dimensions = array<i32: 0>} : vector<16x1xi32>
      %c16_i32_13 = arith.constant 16 : i32
      %32 = arith.muli %19, %c16_i32_13 : i32
      %33 = vector.broadcast %32 : i32 to vector<16x1xi32>
      %34 = arith.addi %31, %33 : vector<16x1xi32>
      %c10_i32_14 = arith.constant 10 : i32
      %35 = vector.broadcast %c10_i32_14 : i32 to vector<16x1xi32>
      %36 = arith.cmpi slt, %34, %35 : vector<16x1xi32>
      %cst_15 = arith.constant 0.000000e+00 : f32
      %37 = vector.shape_cast %36 : vector<16x1xi1> to vector<16x1xi1>
      %38 = vector.broadcast %37 : vector<16x1xi1> to vector<16x160xi1>
      %39 = vector.broadcast %cst_15 : f32 to vector<16x160xf32>
      %40 = arith.select %38, %17, %39 : vector<16x160xi1>, vector<16x160xf32>
      %c0_16 = arith.constant 0 : index
      %c0_17 = arith.constant 0 : index
      %41 = vector.load %arg5[%c0_16, %c0_17] : memref<1x160xf32, #tpu.memory_space<vmem>>, vector<1x160xf32>
      %cst_18 = arith.constant dense<0.000000e+00> : vector<160xf32>
      %42 = vector.multi_reduction <add>, %40, %cst_18 [0] : vector<16x160xf32> to vector<160xf32>
      %43 = vector.shape_cast %42 : vector<160xf32> to vector<1x160xf32>
      %44 = arith.addf %41, %43 : vector<1x160xf32>
      %c0_19 = arith.constant 0 : index
      %c0_20 = arith.constant 0 : index
      %45 = vector.load %arg5[%c0_19, %c0_20] : memref<1x160xf32, #tpu.memory_space<vmem>>, vector<1x160xf32>
      tpu.vector_store %arg5[%c0_19, %c0_20], %44 {strides = array<i32>} : memref<1x160xf32, #tpu.memory_space<vmem>>, vector<1x160xf32>,
    } else {
    }
    %c0_i32_11 = arith.constant 0 : i32
    %28 = arith.cmpi eq, %arg1, %c0_i32_11 : i32
    %29 = arith.extui %28 : i1 to i32
    %c0_i32_12 = arith.constant 0 : i32
    %30 = arith.cmpi ne, %29, %c0_i32_12 : i32
    scf.if %30 {
      %c0_13 = arith.constant 0 : index
      %c0_14 = arith.constant 0 : index
      %31 = vector.load %arg5[%c0_13, %c0_14] : memref<1x160xf32, #tpu.memory_space<vmem>>, vector<1x160xf32>
      %32 = vector.shape_cast %31 : vector<1x160xf32> to vector<1x1x160xf32>
      %cst_15 = arith.constant dense<0.000000e+00> : vector<1xf32>
      %33 = vector.multi_reduction <add>, %32, %cst_15 [1, 2] : vector<1x1x160xf32> to vector<1xf32>
      %34 = vector.shape_cast %33 : vector<1xf32> to vector<1x1x1xf32>
      %35 = vector.extract %34[0, 0, 0] : f32 from vector<1x1x1xf32>
      %c0_16 = arith.constant 0 : index
      %c0_17 = arith.constant 0 : index
      %36 = memref.load %arg4[%c0_16, %c0_17] : memref<1x1xf32, #tpu.memory_space<smem>>
      memref.store %35, %arg4[%c0_16, %c0_17] : memref<1x1xf32, #tpu.memory_space<smem>>
    } else {
    }
    return
  }
  func.func @transform_0(%arg0: i32, %arg1: i32) -> (i32, i32) {
    %c1_i32 = arith.constant 1 : i32
    %0 = arith.muli %arg0, %c1_i32 : i32
    %1 = arith.addi %0, %arg1 : i32
    %c0_i32 = arith.constant 0 : i32
    %2 = arith.minsi %1, %c0_i32 : i32
    %c0_i32_0 = arith.constant 0 : i32
    %c0_i32_1 = arith.constant 0 : i32
    return %2, %c0_i32_0 : i32, i32
  }
  func.func @transform_1(%arg0: i32, %arg1: i32) -> (i32, i32) {
    %c1_i32 = arith.constant 1 : i32
    %0 = arith.muli %arg0, %c1_i32 : i32
    %1 = arith.addi %0, %arg1 : i32
    %c0_i32 = arith.constant 0 : i32
    %2 = arith.minsi %1, %c0_i32 : i32
    %c0_i32_0 = arith.constant 0 : i32
    %c0_i32_1 = arith.constant 0 : i32
    return %2, %c0_i32_0 : i32, i32
  }
  func.func @transform_2(%arg0: i32, %arg1: i32) -> (i32, i32) {
    %c0_i32 = arith.constant 0 : i32
    %c0_i32_0 = arith.constant 0 : i32
    return %arg0, %c0_i32 : i32, i32
  }
}

</mosaic_0001>

<bundles_post_ra>
// kernel: tpu_custom_call.1
= control target key start
LH: loop header
LB: loop body
LE: loop exit
PB: predicated region body
PF: predicated region fallthrough
CT: control target
= control target key end

     0   :  { %7 = vsyncpa [#allocation4], 0  ;;  %s373_s0 = inlined_call_operand.hbm [shape: f32[10,160], index: 0, kind: input, shape index: {}]   ;;  %s374_s1 = inlined_call_operand.vmem [shape: s32[10,1], index: 1, kind: input, shape index: {}]   ;;  %s375_s2 = inlined_call_operand.hbm [shape: f32[1,1], index: 2, kind: output, shape index: {}]  }
   0x1   :  { %8 = vsyncpa [#allocation5], 0  ;;  %s327_s9 = smov [#allocation3]  }
   0x2   :  { %s21_s10 = sshll.u32 %s327_s9, 4  ;;  %s22_s10 = int_to_ptr.vmem [resolvable:$true] %s21_s10 }
   0x3   :  { %s303_s11 = scalar_lea.vmem %s22_s10, 512  ;;  %p308_p1 = scmp.lt.s32.totalorder %s22_s10, %s22_s10 }
   0x4   :  { %p304_p0 = scmp.ne.s32.totalorder %s22_s10, %s303_s11  ;;  %p309_p2 = scmp.lt.s32.totalorder %s303_s11, %s303_s11 }
   0x6   :  { %p310_p3 = por %p309_p2, %p308_p1 }
   0x8   :  { %p311_p4 = pnand %p310_p3, %p304_p0 }
   0xa   :  { %314 = shalt.err (!%p311_p4)
}
   0xb   :  { %s328_s12 = smov 256   ;;  %s329_s13 = smov 16  }
   0xc   :  { %27 = dma.hbm_to_vmem [thread:$0]  %s373_s0, 512, %s22_s10, [#allocation4], %s328_s12, %s328_s12, %s329_s13  }
   0xd   :  { %323 = dma.done.wait [#allocation4], 512  }
   0xe   :  { %324 = vsyncadd [#allocation4], 4294966784  ;;  %v73_v0 = vlaneseq  ;;  %v330_v1 = vmov 0   ;;  %v331_v3 = vmov 0.0   ;;  %v83_v4 = vld [vmem:[%s374_s1 + $0x8] sm:$0xff]  ;;  %v82_v5 = vld [vmem:[%s374_s1] sm:$0xff] }
   0xf   :  { %294 = vset.pattern.permute.xlu0 %v330_v1  ;;  %v80_v8 = vld [vmem:[#allocation3 + $0x10] sm:$0xff]  ;;  %v81_v9 = vld [vmem:[#allocation3 + $0x18] sm:$0xff]  ;;  %vm101_vm1 = vcmask 261120   ;;  %v79_v13 = vld [vmem:[#allocation3 + $0x8] sm:$0xff]  ;;  %v332_v47 = vmov 1966171168  }
  0x10   :  { %vm352_vm0 = vcmp.lt.s32.totalorder %v73_v0, 160  ;;  %91 = vperm.xlu0 %294, %v83_v4   ;;  %v85_v6 = vand.u32 127, %v73_v0  ;;  %v78_v15 = vld [vmem:[#allocation3] sm:$0xff]  ;;  %v175_v22 = vshrl.u32 %v73_v0, 7  ;;  %v112_v23 = vadd.f32 1.0, %v80_v8  ;;  %s333_s19 = smov [#allocation6]  }
  0x11   :  { %77 = vst.msk [vmem:[#allocation2] sm:$0x3] %vm352_vm0, %v331_v3  ;;  %v113_v24 = vadd.f32 1.0, %v81_v9  ;;  %v110_v29 = vadd.f32 1.0, %v78_v15  ;;  %v111_v30 = vadd.f32 1.0, %v79_v13  ;;  %v212_v48 = vunpack.c.l.s4 %v332_v47 }
  0x12   :  { %v86_v7 = vadd.s32 128, %v85_v6  ;;  %v176_v25 = vadd.s32 8, %v175_v22  ;;  %v239_v1 = vsub.s32 0, %v175_v22  ;;  %v243_v3 = vsub.s32 1, %v175_v22 }
  0x13   :  { %v213_v53 = vunpack.c.0.s8 %v212_v48  ;;  %vm247_vm7 = vcmask 1040384   ;;  %vm249_vm8 = vcmask 253952  }
  0x14   :  { %88 = vperm.xlu0 %294, %v82_v5   ;;  %vm182_vm6 = vcmp.lt.s32.totalorder %v176_v25, 10 }
  0x15   :  { %v216_v58 = vsub.s32 %v213_v53, %v175_v22 }
  0x18   :  { %v191_v62 = vld [vmem:[#allocation2] sm:$0x3] }
  0x8b   :  { %v92_v10 = vpop.permute.xlu0 %91 }
  0x8c   :  { %vm95_vm2 = vcmp.eq.s32.totalorder %v85_v6, %v92_v10  ;;  %vm96_vm3 = vcmp.eq.s32.totalorder %v86_v7, %v92_v10 }
  0x8d   :  { %v99_v11 = vsel %vm95_vm2, %v80_v8, 0.0  ;;  %v100_v12 = vsel %vm96_vm3, %v81_v9, 0.0 }
  0x8e   :  { %v106_v14 = vsel %vm101_vm1, %v100_v12, 0.0 }
  0x8f   :  { %v89_v16 = vpop.permute.xlu0 %88  ;;  %v107_v17 = vadd.f32 %v106_v14, %v99_v11 }
  0x90   :  { %vm93_vm4 = vcmp.eq.s32.totalorder %v85_v6, %v89_v16  ;;  %vm94_vm5 = vcmp.eq.s32.totalorder %v86_v7, %v89_v16 }
  0x91   :  { %v98_v18 = vsel %vm94_vm5, %v79_v13, 0.0  ;;  %108 = vadd.xlane.f32.xlu1 %v107_v17  ;;  %v97_v19 = vsel %vm93_vm4, %v78_v15, 0.0 }
  0x92   :  { %v102_v20 = vsel %vm101_vm1, %v98_v18, 0.0 }
  0x93   :  { %v103_v21 = vadd.f32 %v102_v20, %v97_v19 }
  0x95   :  { %104 = vadd.xlane.f32.xlu1 %v103_v21 }
 0x11a   :  { %v109_v26 = vpop.xlane.xlu1 %108 }
 0x11b   :  { %v116_v27 = vsub.f32 %v112_v23, %v109_v26  ;;  %v117_v28 = vsub.f32 %v113_v24, %v109_v26 }
 0x11d   :  { %v121_v31 = vmax.f32 %v117_v28, 0.0  ;;  %v120_v32 = vmax.f32 %v116_v27, 0.0 }
 0x11e   :  { %v105_v33 = vpop.xlane.xlu1 %104 }
 0x11f   :  { %v114_v34 = vsub.f32 %v110_v29, %v105_v33  ;;  %v115_v35 = vsub.f32 %v111_v30, %v105_v33  ;;  %v190_v36 = vsel %vm182_vm6, %v121_v31, 0.0  ;;  %v189_v39 = vsel %vm182_vm6, %v120_v32, 0.0 }
 0x120   :  { %v200_v40 = vsel %vm101_vm1, %v190_v36, 0.0 }
 0x121   :  { %v118_v37 = vmax.f32 %v114_v34, 0.0  ;;  %v119_v38 = vmax.f32 %v115_v35, 0.0 }
 0x123   :  { %v192_v41 = vadd.f32 %v189_v39, %v118_v37  ;;  %v199_v42 = vsel %vm101_vm1, %v119_v38, 0.0 }
 0x124   :  { %v201_v43 = vadd.f32 %v200_v40, %v199_v42 }
 0x125   :  { %v193_v44 = vrot.slane %v192_v41, 4 }
 0x126   :  { %v202_v45 = vrot.slane %v201_v43, 4 }
 0x127   :  { %v194_v46 = vadd.f32 %v193_v44, %v192_v41 }
 0x128   :  { %v203_v49 = vadd.f32 %v202_v45, %v201_v43 }
 0x129   :  { %v195_v50 = vrot.slane %v194_v46, 2 }
 0x12a   :  { %v204_v51 = vrot.slane %v203_v49, 2 }
 0x12b   :  { %v196_v52 = vadd.f32 %v195_v50, %v194_v46 }
 0x12c   :  { %v205_v54 = vadd.f32 %v204_v51, %v203_v49 }
 0x12d   :  { %v197_v55 = vrot.slane %v196_v52, 1 }
 0x12e   :  { %v206_v56 = vrot.slane %v205_v54, 1 }
 0x12f   :  { %v198_v57 = vadd.f32 %v197_v55, %v196_v52 }
 0x130   :  { %v207_v59 = vadd.f32 %v206_v56, %v205_v54 }
 0x132   :  { %v210_v60 = vcombine.low %v198_v57, %v207_v59 }
 0x134   :  { %v217_v61 = vrot.slane %v210_v60, %v216_v58 }
 0x136   :  { %v224_v63 = vrot.slane %v217_v61, %v216_v58 }
 0x138   :  { %v226_v0 = vadd.f32 %v224_v63, %v191_v62 }
 0x13a   :  { %231 = vst.msk [vmem:[#allocation2] sm:$0x3] %vm352_vm0, %v226_v0 }
 0x141   :  { %v235_v4 = vld [vmem:[#allocation2] sm:$0x3] }
 0x142   :  { %v240_v5 = vrot.slane %v235_v4, %v239_v1  ;;  %v244_v6 = vrot.slane %v235_v4, %v243_v3 }
 0x144   :  { %v248_v7 = vsel %vm247_vm7, %v240_v5, 0.0  ;;  %v250_v8 = vsel %vm249_vm8, %v244_v6, 0.0 }
 0x145   :  { %v251_v9 = vadd.f32 %v250_v8, %v248_v7 }
 0x147   :  { %252 = vadd.xlane.f32.xlu0 %v251_v9 }
 0x1d0   :  { %v253_v10 = vpop.xlane.xlu0 %252 }
 0x1d1   :  { %v254_v11 = vrot.slane %v253_v10, 4 }
 0x1d3   :  { %v255_v12 = vadd.f32 %v254_v11, %v253_v10 }
 0x1d5   :  { %v256_v13 = vrot.slane %v255_v12, 2 }
 0x1d7   :  { %v257_v14 = vadd.f32 %v256_v13, %v255_v12 }
 0x1d9   :  { %v258_v15 = vrot.slane %v257_v14, 1 }
 0x1db   :  { %v259_v16 = vadd.f32 %v258_v15, %v257_v14 }
 0x1dd   :  { %285 = vpush %v259_v16 }
 0x20e   :  { %s286_s1 = spop %285 }
 0x20f   :  { %262 = sst [smem:[#allocation6]] %s286_s1 }
 0x210   :  { %270 = dma.smem_to_hbm %s333_s19, 16, %s375_s2, [#allocation5]  }
 0x211   :  { %325 = dma.done.wait [#allocation5], 16  }
 0x212   :  { %326 = vsyncadd [#allocation5], 4294967280 }
 0x213   :  { %274 = sfence }
 0x214   :  { %275 = vsyncpa [#allocation4], 1 }
 0x215   :  { %276 = vsyncpa [#allocation5], 1 }

</bundles_post_ra>
